<compile_context>
chip_gen: v5e
topology: v5e:2x2
jax: 0.10.0
libtpu: 0.0.40
codegen_flags: <defaults>
</compile_context>

<pallas_src>
from functools import partial

import jax
import jax.numpy as jnp
from jax import lax
from jax.experimental import pallas as pl
from jax.experimental.pallas import tpu as pltpu

BN_EPS = 1e-5


def _round_up(v, m):
    return (v + m - 1) // m * m


def _gaze_mlp_kernel(x_ref, w1_ref, b1_ref, w2_ref, b2_ref, w3_ref, b3_ref, o_ref):
    # x_ref: (3, TN) -- features on sublanes, batch on lanes (lane-dense).
    x = x_ref[...]

    # Linear(3, H) + ReLU            (W1: (H, 3), b1: (H, 1))
    h1 = jnp.dot(w1_ref[...], x, preferred_element_type=jnp.float32) + b1_ref[...]
    h1 = jnp.maximum(h1, 0.0)

    # BN1 folded into W2/b2; Dropout(0.2) is identity at inference.
    # TODO(synk): training-mode dropout mask (pltpu.prng_random_bits) not implemented.

    # Linear(H, H//2) + ReLU         (W2': (H//2, H), b2': (H//2, 1))
    h2 = jnp.dot(w2_ref[...], h1, preferred_element_type=jnp.float32) + b2_ref[...]
    h2 = jnp.maximum(h2, 0.0)

    # BN2 folded into W3/b3; Linear(H//2, 2)
    out = jnp.dot(w3_ref[...], h2, preferred_element_type=jnp.float32) + b3_ref[...]
    o_ref[...] = out.astype(o_ref.dtype)


@partial(jax.jit, static_argnames=("tile_n",))
def gaze_prediction_forward(x, params, *, tile_n=8192):
    """x: (N, 3) float32. params: PyTorch-shaped weights / BN stats. Returns (N, 2)."""
    n, in_f = x.shape
    h = params["w1"].shape[0]
    h2 = params["w2"].shape[0]
    out_f = params["w3"].shape[0]

    # --- Fold eval-mode BatchNorms into the following Linear layers (host side) ---
    # BN(y) = y*scale + shift, scale = gamma*rsqrt(var+eps), shift = beta - mean*scale
    s1 = params["g1"] * lax.rsqrt(params["v1"] + BN_EPS)
    t1 = params["be1"] - params["m1"] * s1
    s2 = params["g2"] * lax.rsqrt(params["v2"] + BN_EPS)
    t2 = params["be2"] - params["m2"] * s2

    w1 = params["w1"]                                     # (H, 3)
    b1 = params["b1"][:, None]                            # (H, 1)
    w2 = params["w2"] * s1[None, :]                       # (H//2, H)
    b2 = (params["w2"] @ t1 + params["b2"])[:, None]      # (H//2, 1)
    w3 = params["w3"] * s2[None, :]                       # (2, H//2)
    b3 = (params["w3"] @ t2 + params["b3"])[:, None]      # (2, 1)

    # --- batch-on-lanes layout + padding to a whole number of tiles ---
    tn = _round_up(min(tile_n, _round_up(n, 128)), 128)
    n_pad = _round_up(n, tn)
    xt = jnp.zeros((in_f, n_pad), x.dtype).at[:, :n].set(x.T)   # (3, Npad)

    grid = (n_pad // tn,)
    const = lambda i: (0, 0)   # weights/biases stay VMEM-resident across grid steps

    weight_bytes = 4 * sum(a.size for a in (w1, b1, w2, b2, w3, b3))
    cost = pl.CostEstimate(
        flops=2 * n_pad * (in_f * h + h * h2 + h2 * out_f),
        transcendentals=0,
        bytes_accessed=n_pad * (in_f + out_f) * 4 + weight_bytes,
    )

    out_t = pl.pallas_call(
        _gaze_mlp_kernel,
        out_shape=jax.ShapeDtypeStruct((out_f, n_pad), jnp.float32),
        grid=grid,
        in_specs=[
            pl.BlockSpec((in_f, tn), lambda i: (0, i)),   # x tile: lane-dense batch
            pl.BlockSpec(w1.shape, const),
            pl.BlockSpec(b1.shape, const),
            pl.BlockSpec(w2.shape, const),
            pl.BlockSpec(b2.shape, const),
            pl.BlockSpec(w3.shape, const),
            pl.BlockSpec(b3.shape, const),
        ],
        out_specs=pl.BlockSpec((out_f, tn), lambda i: (0, i)),
        compiler_params=pltpu.CompilerParams(
            dimension_semantics=("parallel",),            # v7x: 2 TCs split the batch
        ),
        cost_estimate=cost,
    )(xt, w1, b1, w2, b2, w3, b3)

    return out_t[:, :n].T                                  # back to (N, 2)


def init_params(key, hidden_size=32):
    """Deterministic synthetic params in PyTorch orientation: Linear W is (out, in)."""
    in_size, out_size = 3, 2
    h1, h2 = hidden_size, hidden_size // 2
    keys = jax.random.split(key, 12)

    def lin(kw, kb, fan_in, fan_out):
        bound = 1.0 / jnp.sqrt(fan_in)
        w = jax.random.uniform(kw, (fan_out, fan_in), jnp.float32, -bound, bound)
        b = jax.random.uniform(kb, (fan_out,), jnp.float32, -bound, bound)
        return w, b

    w1, b1 = lin(keys[0], keys[1], in_size, h1)
    w2, b2 = lin(keys[2], keys[3], h1, h2)
    w3, b3 = lin(keys[4], keys[5], h2, out_size)

    return dict(
        w1=w1, b1=b1,
        g1=1.0 + 0.1 * jax.random.normal(keys[6], (h1,), jnp.float32),
        be1=0.1 * jax.random.normal(keys[7], (h1,), jnp.float32),
        m1=0.05 * jax.random.normal(keys[8], (h1,), jnp.float32),
        v1=1.0 + 0.1 * jax.random.uniform(keys[9], (h1,), jnp.float32),
        w2=w2, b2=b2,
        g2=1.0 + 0.1 * jax.random.normal(keys[10], (h2,), jnp.float32),
        be2=0.1 * jax.random.normal(keys[11], (h2,), jnp.float32),
        m2=jnp.zeros((h2,), jnp.float32),
        v2=jnp.ones((h2,), jnp.float32),
        w3=w3, b3=b3,
    )


def reference_forward(x, p):
    h1 = jnp.maximum(x @ p["w1"].T + p["b1"], 0.0)
    h1 = (h1 - p["m1"]) / jnp.sqrt(p["v1"] + BN_EPS) * p["g1"] + p["be1"]
    h2 = jnp.maximum(h1 @ p["w2"].T + p["b2"], 0.0)
    h2 = (h2 - p["m2"]) / jnp.sqrt(p["v2"] + BN_EPS) * p["g2"] + p["be2"]
    return h2 @ p["w3"].T + p["b3"]


if __name__ == "__main__":
    key = jax.random.PRNGKey(0)
    k_param, k_x = jax.random.split(key)

    hidden_size = 32
    params = init_params(k_param, hidden_size=hidden_size)

    # (batch < one tile) and (multi-tile batch) to exercise padding + the grid.
    for batch, tile_n in ((8, 128), (300, 128)):
        x = jax.random.normal(jax.random.fold_in(k_x, batch), (batch, 3), jnp.float32)
        out = jax.block_until_ready(gaze_prediction_forward(x, params, tile_n=tile_n))
        ref = reference_forward(x, params)
        assert out.shape == (batch, 2)
        assert jnp.allclose(out, ref, atol=1e-4, rtol=1e-4), f"mismatch at batch={batch}"

    print("KERNEL_OK")
</pallas_src>

<mosaic_0001>
module attributes {stable_mosaic.version = 11 : i64} {
  func.func @_gaze_mlp_kernel(%arg0: i32, %arg1: memref<3x128xf32, #tpu.memory_space<vmem>>, %arg2: memref<32x3xf32, #tpu.memory_space<vmem>>, %arg3: memref<32x1xf32, #tpu.memory_space<vmem>>, %arg4: memref<16x32xf32, #tpu.memory_space<vmem>>, %arg5: memref<16x1xf32, #tpu.memory_space<vmem>>, %arg6: memref<2x16xf32, #tpu.memory_space<vmem>>, %arg7: memref<2x1xf32, #tpu.memory_space<vmem>>, %arg8: memref<2x128xf32, #tpu.memory_space<vmem>>) attributes {dimension_semantics = [#tpu.dimension_semantics<parallel>], iteration_bounds = array<i64: 1>, scalar_prefetch = 0 : i64, scratch_operands = 0 : i64, tpu.core_type = #tpu.core_type<tc>, window_params = [{transform_indices = @transform_0, window_bounds = array<i64: 3, 128>}, {pipeline_mode = #tpu.pipeline_mode<synchronous>, transform_indices = @transform_1, window_bounds = array<i64: 32, 3>}, {pipeline_mode = #tpu.pipeline_mode<synchronous>, transform_indices = @transform_2, window_bounds = array<i64: 32, 1>}, {pipeline_mode = #tpu.pipeline_mode<synchronous>, transform_indices = @transform_3, window_bounds = array<i64: 16, 32>}, {pipeline_mode = #tpu.pipeline_mode<synchronous>, transform_indices = @transform_4, window_bounds = array<i64: 16, 1>}, {pipeline_mode = #tpu.pipeline_mode<synchronous>, transform_indices = @transform_5, window_bounds = array<i64: 2, 16>}, {pipeline_mode = #tpu.pipeline_mode<synchronous>, transform_indices = @transform_6, window_bounds = array<i64: 2, 1>}, {transform_indices = @transform_7, window_bounds = array<i64: 2, 128>}]} {
    %c0 = arith.constant 0 : index
    %c0_0 = arith.constant 0 : index
    %0 = vector.load %arg1[%c0, %c0_0] : memref<3x128xf32, #tpu.memory_space<vmem>>, vector<3x128xf32>
    %c0_1 = arith.constant 0 : index
    %c0_2 = arith.constant 0 : index
    %1 = vector.load %arg2[%c0_1, %c0_2] : memref<32x3xf32, #tpu.memory_space<vmem>>, vector<32x3xf32>
    %cst = arith.constant dense<0.000000e+00> : vector<32x128xf32>
    %2 = tpu.matmul %1, %0, %cst {dimension_numbers = #tpu.dot_dimension_numbers<[1], [0], [0], [1], [0, 0, 1, 1], [], []>} : vector<32x3xf32>, vector<3x128xf32>, vector<32x128xf32> -> vector<32x128xf32>
    %c0_3 = arith.constant 0 : index
    %c0_4 = arith.constant 0 : index
    %3 = vector.load %arg3[%c0_3, %c0_4] : memref<32x1xf32, #tpu.memory_space<vmem>>, vector<32x1xf32>
    %4 = vector.broadcast %3 : vector<32x1xf32> to vector<32x128xf32>
    %5 = arith.addf %2, %4 : vector<32x128xf32>
    %cst_5 = arith.constant 0.000000e+00 : f32
    %6 = vector.broadcast %cst_5 : f32 to vector<32x128xf32>
    %7 = arith.maximumf %5, %6 : vector<32x128xf32>
    %c0_6 = arith.constant 0 : index
    %c0_7 = arith.constant 0 : index
    %8 = vector.load %arg4[%c0_6, %c0_7] : memref<16x32xf32, #tpu.memory_space<vmem>>, vector<16x32xf32>
    %cst_8 = arith.constant dense<0.000000e+00> : vector<16x128xf32>
    %9 = tpu.matmul %8, %7, %cst_8 {dimension_numbers = #tpu.dot_dimension_numbers<[1], [0], [0], [1], [0, 0, 1, 1], [], []>} : vector<16x32xf32>, vector<32x128xf32>, vector<16x128xf32> -> vector<16x128xf32>
    %c0_9 = arith.constant 0 : index
    %c0_10 = arith.constant 0 : index
    %10 = vector.load %arg5[%c0_9, %c0_10] : memref<16x1xf32, #tpu.memory_space<vmem>>, vector<16x1xf32>
    %11 = vector.broadcast %10 : vector<16x1xf32> to vector<16x128xf32>
    %12 = arith.addf %9, %11 : vector<16x128xf32>
    %cst_11 = arith.constant 0.000000e+00 : f32
    %13 = vector.broadcast %cst_11 : f32 to vector<16x128xf32>
    %14 = arith.maximumf %12, %13 : vector<16x128xf32>
    %c0_12 = arith.constant 0 : index
    %c0_13 = arith.constant 0 : index
    %15 = vector.load %arg6[%c0_12, %c0_13] : memref<2x16xf32, #tpu.memory_space<vmem>>, vector<2x16xf32>
    %cst_14 = arith.constant dense<0.000000e+00> : vector<2x128xf32>
    %16 = tpu.matmul %15, %14, %cst_14 {dimension_numbers = #tpu.dot_dimension_numbers<[1], [0], [0], [1], [0, 0, 1, 1], [], []>} : vector<2x16xf32>, vector<16x128xf32>, vector<2x128xf32> -> vector<2x128xf32>
    %c0_15 = arith.constant 0 : index
    %c0_16 = arith.constant 0 : index
    %17 = vector.load %arg7[%c0_15, %c0_16] : memref<2x1xf32, #tpu.memory_space<vmem>>, vector<2x1xf32>
    %18 = vector.broadcast %17 : vector<2x1xf32> to vector<2x128xf32>
    %19 = arith.addf %16, %18 : vector<2x128xf32>
    %c0_17 = arith.constant 0 : index
    %c0_18 = arith.constant 0 : index
    %20 = vector.load %arg8[%c0_17, %c0_18] : memref<2x128xf32, #tpu.memory_space<vmem>>, vector<2x128xf32>
    tpu.vector_store %arg8[%c0_17, %c0_18], %19 {strides = array<i32>} : memref<2x128xf32, #tpu.memory_space<vmem>>, vector<2x128xf32>,
    return
  }
  func.func @transform_0(%arg0: i32) -> (i32, i32) {
    %c0_i32 = arith.constant 0 : i32
    %c0_i32_0 = arith.constant 0 : i32
    return %c0_i32, %arg0 : i32, i32
  }
  func.func @transform_1(%arg0: i32) -> (i32, i32) {
    %c0_i32 = arith.constant 0 : i32
    %c0_i32_0 = arith.constant 0 : i32
    %c0_i32_1 = arith.constant 0 : i32
    return %c0_i32, %c0_i32_0 : i32, i32
  }
  func.func @transform_2(%arg0: i32) -> (i32, i32) {
    %c0_i32 = arith.constant 0 : i32
    %c0_i32_0 = arith.constant 0 : i32
    %c0_i32_1 = arith.constant 0 : i32
    return %c0_i32, %c0_i32_0 : i32, i32
  }
  func.func @transform_3(%arg0: i32) -> (i32, i32) {
    %c0_i32 = arith.constant 0 : i32
    %c0_i32_0 = arith.constant 0 : i32
    %c0_i32_1 = arith.constant 0 : i32
    return %c0_i32, %c0_i32_0 : i32, i32
  }
  func.func @transform_4(%arg0: i32) -> (i32, i32) {
    %c0_i32 = arith.constant 0 : i32
    %c0_i32_0 = arith.constant 0 : i32
    %c0_i32_1 = arith.constant 0 : i32
    return %c0_i32, %c0_i32_0 : i32, i32
  }
  func.func @transform_5(%arg0: i32) -> (i32, i32) {
    %c0_i32 = arith.constant 0 : i32
    %c0_i32_0 = arith.constant 0 : i32
    %c0_i32_1 = arith.constant 0 : i32
    return %c0_i32, %c0_i32_0 : i32, i32
  }
  func.func @transform_6(%arg0: i32) -> (i32, i32) {
    %c0_i32 = arith.constant 0 : i32
    %c0_i32_0 = arith.constant 0 : i32
    %c0_i32_1 = arith.constant 0 : i32
    return %c0_i32, %c0_i32_0 : i32, i32
  }
  func.func @transform_7(%arg0: i32) -> (i32, i32) {
    %c0_i32 = arith.constant 0 : i32
    %c0_i32_0 = arith.constant 0 : i32
    return %c0_i32, %arg0 : i32, i32
  }
}

</mosaic_0001>

<bundles_post_ra>
// kernel: gaze_prediction_forward.1
= control target key start
LH: loop header
LB: loop body
LE: loop exit
PB: predicated region body
PF: predicated region fallthrough
CT: control target
= control target key end

     0   :  { %vm68_vm0 = vcmask 1042432   ;;  %vm55_vm1 = vcmask 23552   ;;  %v200_v2 = vmov 0   ;;  %vm119_vm2 = vcmask 261120   ;;  %s293_s0 = inlined_call_operand.vmem [shape: f32[3,128], index: 0, kind: input, shape index: {}]   ;;  %s294_s1 = inlined_call_operand.vmem [shape: f32[32,3], index: 1, kind: input, shape index: {}]   ;;  %s295_s2 = inlined_call_operand.vmem [shape: f32[32,1], index: 2, kind: input, shape index: {}]   ;;  %s296_s6 = inlined_call_operand.vmem [shape: f32[2,1], index: 6, kind: input, shape index: {}]   ;;  %s297_s4 = inlined_call_operand.vmem [shape: f32[16,1], index: 4, kind: input, shape index: {}]   ;;  %s298_s3 = inlined_call_operand.vmem [shape: f32[16,32], index: 3, kind: input, shape index: {}]   ;;  %s299_s5 = inlined_call_operand.vmem [shape: f32[2,16], index: 5, kind: input, shape index: {}]   ;;  %s300_s7 = inlined_call_operand.vmem [shape: f32[2,128], index: 7, kind: output, shape index: {}]  }
   0x1   :  { %v26_v0 = vld [vmem:[%s293_s0] sm:$0x7]  ;;  %v29_v1 = vld [vmem:[%s294_s1 + $0x10] sm:$0xff]  ;;  %197 = vset.pattern.permute.xlu0 %v200_v2  ;;  %v34_v3 = vld [vmem:[%s295_s2 + $0x18] sm:$0xff]  ;;  %198 = vset.pattern.permute.xlu1 %v200_v2  ;;  %vm158_vm3 = vcmask 130048  }
   0x2   :  { %195 = vmatpush.msk.msra.mxu3 %vm68_vm0, %v26_v0  ;;  %52 = vperm.xlu0 %197, %v34_v3   ;;  %v27_v4 = vld [vmem:[%s294_s1] sm:$0xff]  ;;  %v32_v5 = vld [vmem:[%s295_s2 + $0x8] sm:$0xff]  ;;  %v33_v6 = vld [vmem:[%s295_s2 + $0x10] sm:$0xff] }
   0x3   :  { %190 = vmatmul.msk.f32.vlgmr.msra.gmra.mxu3 %vm55_vm1, %v29_v1  ;;  %187 = vmatpush.msk.msra.mxu0 %vm68_vm0, %v26_v0  ;;  %v30_v7 = vld [vmem:[%s294_s1 + $0x18] sm:$0xff]  ;;  %v28_v8 = vld [vmem:[%s294_s1 + $0x8] sm:$0xff]  ;;  %v31_v9 = vld [vmem:[%s295_s2] sm:$0xff] }
   0x4   :  { %188 = vmatmul.msk.f32.vlgmr.msra.gmra.mxu0 %vm55_vm1, %v27_v4  ;;  %42 = vperm.xlu1 %198, %v32_v5   ;;  %v152_v10 = vld [vmem:[%s296_s6] sm:$0x3]  ;;  %v108_v11 = vld [vmem:[%s297_s4 + $0x8] sm:$0xff] }
   0x5   :  { %199 = vset.pattern.permute.xlu2 %v200_v2  ;;  %v107_v16 = vld [vmem:[%s297_s4] sm:$0xff]  ;;  %v106_v30 = vld [vmem:[%s298_s3 + $0x8] sm:$0xff] }
   0x6   :  { %116 = vperm.xlu2 %199, %v108_v11   ;;  %v105_v29 = vld [vmem:[%s298_s3] sm:$0xff] }
   0x7   :  { %v151_v39 = vld [vmem:[%s299_s5] sm:$0x3] }
   0xa   :  { %47 = vperm.xlu0 %197, %v33_v6  }
   0xb   :  { %191 = vmatmul.msk.f32.gmra.mxu3 %vm55_vm1, %v30_v7 }
   0xc   :  { %189 = vmatmul.msk.f32.gmra.mxu0 %vm55_vm1, %v28_v8  ;;  %37 = vperm.xlu1 %198, %v31_v9  }
   0xe   :  { %111 = vperm.xlu2 %199, %v107_v16  }
  0x12   :  { %155 = vperm.xlu0 %197, %v152_v10  }
  0x60   :  { %v117_v31 = vpop.permute.xlu2 %116 }
  0x68   :  { %v112_v33 = vpop.permute.xlu2 %111 }
  0x74   :  { %v53_v12 = vpop.permute.xlu0 %52 }
  0x76   :  { %v43_v14 = vpop.permute.xlu1 %42 }
  0x7c   :  { %v48_v17 = vpop.permute.xlu0 %47 }
  0x7e   :  { %v38_v22 = vpop.permute.xlu1 %37 }
  0x81   :  { %v89_v13 = vpop.f32.mrf.mxu0 }
  0x82   :  { %v90_v26 = vadd.f32 %v89_v13, %v38_v22 }
  0x84   :  { %v101_v28 = vmax.f32 %v90_v26, 0.0  ;;  %v156_v40 = vpop.permute.xlu0 %155 }
  0x86   :  { %v95_v15 = vpop.f32.mrf.mxu3 }
  0x87   :  { %v96_v20 = vadd.f32 %v95_v15, %v48_v17 }
  0x89   :  { %v92_v18 = vpop.f32.mrf.mxu0  ;;  %v103_v25 = vmax.f32 %v96_v20, 0.0 }
  0x8a   :  { %v93_v23 = vadd.f32 %v92_v18, %v43_v14 }
  0x8c   :  { %v102_v27 = vmax.f32 %v93_v23, 0.0 }
  0x8e   :  { %v98_v19 = vpop.f32.mrf.mxu3 }
  0x8f   :  { %v99_v21 = vadd.f32 %v98_v19, %v53_v12 }
  0x91   :  { %v104_v24 = vmax.f32 %v99_v21, 0.0 }
  0x93   :  { %138 = vmatpush.msra.mxu1 %v104_v24 }
  0x95   :  { %139 = vmatpush.msra.mxu1 %v103_v25 }
  0x97   :  { %140 = vmatpush.msra.mxu1 %v102_v27 }
  0x99   :  { %141 = vmatpush.msra.mxu1 %v101_v28 }
  0x9a   :  { %192 = vmatmul.msk.f32.vlgmr.msra.gmra.mxu1 %vm119_vm2, %v105_v29 }
  0xa2   :  { %193 = vmatmul.msk.f32.gmra.mxu1 %vm119_vm2, %v106_v30 }
 0x117   :  { %v143_v32 = vpop.f32.mrf.mxu1 }
 0x118   :  { %v144_v35 = vadd.f32 %v143_v32, %v112_v33 }
 0x11a   :  { %v149_v38 = vmax.f32 %v144_v35, 0.0 }
 0x11f   :  { %v146_v34 = vpop.f32.mrf.mxu1 }
 0x120   :  { %v147_v36 = vadd.f32 %v146_v34, %v117_v31 }
 0x122   :  { %v150_v37 = vmax.f32 %v147_v36, 0.0 }
 0x124   :  { %176 = vmatpush.msra.mxu2 %v150_v37 }
 0x126   :  { %177 = vmatpush.msra.mxu2 %v149_v38 }
 0x127   :  { %194 = vmatmul.msk.f32.vlgmr.msra.gmra.mxu2 %vm158_vm3, %v151_v39 }
 0x1aa   :  { %v179_v41 = vpop.f32.mrf.mxu2 }
 0x1ab   :  { %v180_v42 = vadd.f32 %v179_v41, %v156_v40 }
 0x1ad   :  { %182 = vst [vmem:[%s300_s7] sm:$0x3] %v180_v42 }

</bundles_post_ra>
